<compile_context>
chip_gen: v7x
topology: tpu7x:2x2x1
jax: 0.10.0
libtpu: 0.0.40
codegen_flags: <defaults>
</compile_context>

<pallas_src>
import jax
import jax.numpy as jnp
from jax.experimental import pallas as pl
from jax.experimental.pallas import tpu as pltpu


# --------------------------------------------------------------------------
# Tiling helpers
# --------------------------------------------------------------------------

def _sublane_multiple(dtypes):
    """Minimum sublane multiple for the block's second-to-last dim."""
    m = 8
    for dt in dtypes:
        itemsize = jnp.dtype(dt).itemsize
        if itemsize < 4:
            m = max(m, 8 * (4 // itemsize))
    return m


def _divisor_candidates(dim, cands, multiple):
    """Legal block sizes: divide `dim`, respect hw tiling; full dim always ok."""
    out = [c for c in cands if c < dim and dim % c == 0 and c % multiple == 0]
    out.append(dim)
    return sorted(set(out), reverse=True)


def _tpu_budget():
    """Return (physical VMEM bytes, is_multi_tensorcore_chip)."""
    kind = ""
    try:
        kind = (jax.devices()[0].device_kind or "").lower()
    except Exception:
        pass
    is_v7 = "v7" in kind
    vmem_cap = None
    try:
        vmem_cap = int(pltpu.get_tpu_info().vmem_capacity_bytes)
    except Exception:
        vmem_cap = None
    if vmem_cap is None:
        vmem_cap = (64 << 20) if is_v7 else (128 << 20)
    return vmem_cap, is_v7


def _select_tiles(bb_cands, bt_cands, bytes_per_elem, buf_budget, B,
                  force_split_b):
    """Largest (bB, bT) whose double-buffered input tiles fit `buf_budget`."""
    if force_split_b:
        split = [c for c in bb_cands if c <= B // 2]
        if split:
            bb_cands = split
    best = None
    fallback = None
    for bb in bb_cands:
        for bt in bt_cands:
            ws = 2 * bb * bt * bytes_per_elem     # double-buffered input tiles
            score = (bb * bt, bt)
            if fallback is None or score < fallback[0]:
                fallback = (score, bb, bt)
            if ws <= buf_budget and (best is None or score > best[0]):
                best = (score, bb, bt)
    chosen = best if best is not None else fallback
    return chosen[1], chosen[2]


# --------------------------------------------------------------------------
# Kernel
# --------------------------------------------------------------------------

def _make_value_loss_kernel(clip_eps, mask_mode, total_t, bB, bT):
    """mask_mode in {"none", "full", "lengths"}."""
    clipped = clip_eps is not None
    masked = mask_mode != "none"
    lane_w = 128 if bT % 128 == 0 else bT
    n_chunks = bT // lane_w

    def lane_accumulate(x):
        # (bB, bT) -> (bB, lane_w): sum lane-aligned chunks on the VPU only.
        acc = x[:, :lane_w]
        for j in range(1, n_chunks):
            acc = acc + x[:, j * lane_w:(j + 1) * lane_w]
        return acc

    def kernel(*refs):
        idx = 0
        values_ref = refs[idx]; idx += 1
        old_values_ref = None
        if clipped:
            old_values_ref = refs[idx]; idx += 1
        returns_ref = refs[idx]; idx += 1
        mask_ref = None
        lens_ref = None
        if mask_mode == "full":
            mask_ref = refs[idx]; idx += 1
        elif mask_mode == "lengths":
            lens_ref = refs[idx]; idx += 1
        out_ref = refs[idx]; idx += 1
        row_num_acc = refs[idx]; idx += 1
        row_den_acc = None
        if masked:
            row_den_acc = refs[idx]; idx += 1
        cf_acc = None
        if clipped:
            cf_acc = refs[idx]; idx += 1

        k = pl.program_id(1)

        @pl.when(k == 0)
        def _init():
            row_num_acc[...] = jnp.zeros_like(row_num_acc)
            if masked:
                row_den_acc[...] = jnp.zeros_like(row_den_acc)
            if clipped:
                cf_acc[...] = jnp.zeros_like(cf_acc)

        v = values_ref[...].astype(jnp.float32)
        r = returns_ref[...].astype(jnp.float32)

        if clipped:
            ov = old_values_ref[...].astype(jnp.float32)
            v_clipped = ov + jnp.clip(v - ov, -clip_eps, clip_eps)
            surr1 = (v_clipped - r) ** 2
            surr2 = (v - r) ** 2
            loss = jnp.maximum(surr1, surr2)
            clip_ind = (surr1 > surr2).astype(jnp.float32)
        else:
            loss = (v - r) ** 2
            clip_ind = None

        if mask_mode == "full":
            m = mask_ref[...].astype(jnp.float32)
        elif mask_mode == "lengths":
            lens = lens_ref[...].astype(jnp.int32)          # (bB, 1)
            col = jax.lax.broadcasted_iota(jnp.int32, (bB, bT), 1) + k * bT
            m = (col < lens).astype(jnp.float32)            # strict <, f32 cast
        else:
            m = None

        if masked:
            row_num_acc[...] += lane_accumulate(loss * m)
            row_den_acc[...] += lane_accumulate(m)
            if clipped:
                cf_acc[...] += lane_accumulate(clip_ind * m)
        else:
            row_num_acc[...] += lane_accumulate(loss)
            if clipped:
                cf_acc[...] += lane_accumulate(clip_ind)

        @pl.when(k == pl.num_programs(1) - 1)
        def _finalize():
            num = jnp.sum(row_num_acc[...], axis=-1, keepdims=True)   # (bB, 1)
            if masked:
                den = jnp.sum(row_den_acc[...], axis=-1, keepdims=True)
            else:
                den = jnp.full_like(num, float(total_t))
            # NOTE: all-zero-mask rows yield NaN per-row means (reference
            # semantics).
            per_row = num / den                                       # (bB, 1)
            loss_part = jnp.sum(per_row)
            if clipped:
                cf_num = jnp.sum(cf_acc[...])
                cf_den = jnp.sum(den)
            else:
                cf_num = jnp.float32(0.0)
                cf_den = jnp.float32(0.0)
            lane = jax.lax.broadcasted_iota(jnp.int32, (1, 1, 4), 2)
            packed = jnp.where(
                lane == 0, loss_part,
                jnp.where(lane == 1, cf_num,
                          jnp.where(lane == 2, cf_den, 0.0)))
            out_ref[...] = packed.astype(jnp.float32)

    return kernel


# --------------------------------------------------------------------------
# Wrapper
# --------------------------------------------------------------------------

def value_loss(values, old_values, returns, loss_mask=None, clip_eps=0.2,
               *, loss_mask_lengths=None, block_b=None, block_t=None):
    """Returns (0.5 * masked PPO value loss, clipfrac) as device scalars.

    clipfrac is None when clip_eps is None (matching the PyTorch module).
    Fully jittable (clip_eps / block sizes are Python-static).

    Performance contract: feed bf16 (or f32) values/old_values/returns and a
    bf16/int8/bool mask directly -- the kernel upcasts to f32 in VMEM, so
    lower-precision inputs directly cut HBM traffic.  If the mask is a
    per-row length mask, pass `loss_mask_lengths` (shape (B,)) instead of a
    full (B, T) `loss_mask` to remove that HBM stream entirely.
    """
    B, T = values.shape
    clipped = clip_eps is not None
    if loss_mask is not None and loss_mask_lengths is not None:
        raise ValueError("pass either loss_mask or loss_mask_lengths, not both")
    if loss_mask_lengths is not None:
        mask_mode = "lengths"
    elif loss_mask is not None:
        mask_mode = "full"
    else:
        mask_mode = "none"
    masked = mask_mode != "none"

    # Only DMA what the selected path actually needs.  `big_inputs` are the
    # (B, T) streams that dominate HBM traffic.
    big_inputs = [values]
    if clipped:
        big_inputs.append(old_values)
    big_inputs.append(returns)
    if mask_mode == "full":
        big_inputs.append(loss_mask)

    sub = _sublane_multiple([x.dtype for x in big_inputs])
    bytes_per_elem = sum(jnp.dtype(x.dtype).itemsize for x in big_inputs)

    vmem_cap, multicore = _tpu_budget()
    # Per-generation budget for double-buffered input tiles.
    buf_budget = (40 << 20) if vmem_cap <= (64 << 20) else (96 << 20)

    bb_cands = _divisor_candidates(B, (512, 256, 128, 64, 32, 16, 8), sub)
    bt_cands = _divisor_candidates(T, (4096, 2048, 1024, 512, 256, 128), 128)
    auto_bB, auto_bT = _select_tiles(bb_cands, bt_cands, bytes_per_elem,
                                     buf_budget, B, force_split_b=multicore)
    bB = block_b if block_b is not None else auto_bB
    bT = block_t if block_t is not None else auto_bT

    assert B % bB == 0 and T % bT == 0, "block sizes must divide (B, T)"
    assert bB == B or bB % sub == 0, "block_b violates sublane tiling"
    assert bT == T or bT % 128 == 0, "block_t must be a multiple of 128"

    grid_b, grid_t = B // bB, T // bT

    # Assemble inputs / specs in the order the kernel unpacks them.
    inputs = [values]
    in_specs = [pl.BlockSpec((bB, bT), lambda i, k: (i, k))]
    if clipped:
        inputs.append(old_values)
        in_specs.append(pl.BlockSpec((bB, bT), lambda i, k: (i, k)))
    inputs.append(returns)
    in_specs.append(pl.BlockSpec((bB, bT), lambda i, k: (i, k)))
    if mask_mode == "full":
        inputs.append(loss_mask)
        in_specs.append(pl.BlockSpec((bB, bT), lambda i, k: (i, k)))
    elif mask_mode == "lengths":
        lengths = jnp.asarray(loss_mask_lengths).reshape(B, 1).astype(jnp.int32)
        inputs.append(lengths)
        in_specs.append(pl.BlockSpec((bB, 1), lambda i, k: (i, 0)))

    # Single packed partial-sum output: [loss_partial, cf_num, cf_den, pad].
    out_shape = jax.ShapeDtypeStruct((grid_b, 1, 4), jnp.float32)
    out_spec = pl.BlockSpec((1, 1, 4), lambda i, k: (i, 0, 0))

    lane_w = 128 if bT % 128 == 0 else bT
    scratch_shapes = [pltpu.VMEM((bB, lane_w), jnp.float32)]          # row_num
    if masked:
        scratch_shapes.append(pltpu.VMEM((bB, lane_w), jnp.float32))  # row_den
    if clipped:
        scratch_shapes.append(pltpu.VMEM((bB, lane_w), jnp.float32))  # clipfrac

    # VMEM limit derived exactly from the working set, capped per generation.
    tile_bytes = bB * bT * bytes_per_elem
    scratch_bytes = len(scratch_shapes) * bB * 128 * 4
    need = 2 * tile_bytes + scratch_bytes + (4 << 20)
    vmem_limit = int(min(max(need, 16 << 20),
                         max(vmem_cap - (8 << 20), 16 << 20)))

    kernel = _make_value_loss_kernel(clip_eps, mask_mode, T, bB, bT)

    # TODO(synk): on v7x, sweep pipeline_mode=pl.Buffered(3) on the input
    # BlockSpecs if profiling shows exposed DMA between grid steps.
    parts = pl.pallas_call(
        kernel,
        out_shape=out_shape,
        grid_spec=pltpu.PrefetchScalarGridSpec(
            num_scalar_prefetch=0,
            grid=(grid_b, grid_t),
            in_specs=in_specs,
            out_specs=out_spec,
            scratch_shapes=scratch_shapes,
        ),
        compiler_params=pltpu.CompilerParams(
            dimension_semantics=("parallel", "arbitrary"),
            vmem_limit_bytes=vmem_limit,
        ),
    )(*inputs)

    loss = 0.5 * jnp.sum(parts[:, 0, 0]) / B
    if clipped:
        clipfrac = jnp.sum(parts[:, 0, 1]) / jnp.sum(parts[:, 0, 2])
    else:
        clipfrac = None
    return loss, clipfrac


# --------------------------------------------------------------------------
# Pure-JAX reference (mirrors the PyTorch module)
# --------------------------------------------------------------------------

def _value_loss_ref(values, old_values, returns, loss_mask, clip_eps):
    values = values.astype(jnp.float32)
    old_values = old_values.astype(jnp.float32)
    returns = returns.astype(jnp.float32)
    if loss_mask is None:
        loss_mask = jnp.ones_like(values)
    loss_mask = loss_mask.astype(jnp.float32)
    if clip_eps is not None:
        vc = old_values + jnp.clip(values - old_values, -clip_eps, clip_eps)
        surr1 = (vc - returns) ** 2
        surr2 = (values - returns) ** 2
        loss = jnp.maximum(surr1, surr2)
        clipfrac = jnp.sum((surr1 > surr2) * loss_mask) / jnp.sum(loss_mask)
    else:
        loss = (values - returns) ** 2
        clipfrac = None
    per_row = jnp.sum(loss * loss_mask, -1) / jnp.sum(loss_mask, -1)
    return 0.5 * jnp.mean(per_row), clipfrac


if __name__ == "__main__":
    key = jax.random.PRNGKey(0)
    k1, k2, k3 = jax.random.split(key, 3)

    # ---- small (batch, seq) case, clipped + full mask --------------------
    B, T = 4, 16
    values = jax.random.normal(k1, (B, T), jnp.float32)
    old_values = values + 0.3 * jax.random.normal(k2, (B, T), jnp.float32)
    returns = jax.random.normal(k3, (B, T), jnp.float32)
    lens = jnp.array([16, 12, 8, 10])
    loss_mask = (jnp.arange(T)[None, :] < lens[:, None]).astype(jnp.float32)

    clip_eps = 0.2
    loss, clipfrac = value_loss(values, old_values, returns, loss_mask, clip_eps)
    jax.block_until_ready(loss)
    ref_loss, ref_cf = _value_loss_ref(values, old_values, returns, loss_mask,
                                       clip_eps)
    assert jnp.allclose(loss, ref_loss, rtol=1e-5, atol=1e-6), (loss, ref_loss)
    assert jnp.allclose(clipfrac, ref_cf, rtol=1e-5, atol=1e-6), (clipfrac, ref_cf)

    # ---- lengths path (no (B,T) mask DMA, mask synthesized in-kernel) ----
    loss_l, cf_l = value_loss(values, old_values, returns, None, clip_eps,
                              loss_mask_lengths=lens)
    jax.block_until_ready(loss_l)
    assert jnp.allclose(loss_l, ref_loss, rtol=1e-5, atol=1e-6)
    assert jnp.allclose(cf_l, ref_cf, rtol=1e-5, atol=1e-6)

    # ---- clip_eps=None path (no old_values DMA, clipfrac must be None) ---
    loss2, clipfrac2 = value_loss(values, old_values, returns, loss_mask, None)
    jax.block_until_ready(loss2)
    ref_loss2, _ = _value_loss_ref(values, old_values, returns, loss_mask, None)
    assert clipfrac2 is None
    assert jnp.allclose(loss2, ref_loss2, rtol=1e-5, atol=1e-6)

    # ---- loss_mask=None path (no mask DMA, denominator = T) --------------
    loss3, clipfrac3 = value_loss(values, old_values, returns, None, clip_eps)
    jax.block_until_ready(loss3)
    ref_loss3, ref_cf3 = _value_loss_ref(values, old_values, returns, None,
                                         clip_eps)
    assert jnp.allclose(loss3, ref_loss3, rtol=1e-5, atol=1e-6)
    assert jnp.allclose(clipfrac3, ref_cf3, rtol=1e-5, atol=1e-6)

    # ---- bf16 inputs fed directly (kernel upcasts in VMEM) ---------------
    v_bf = values.astype(jnp.bfloat16)
    ov_bf = old_values.astype(jnp.bfloat16)
    r_bf = returns.astype(jnp.bfloat16)
    loss4, clipfrac4 = value_loss(v_bf, ov_bf, r_bf, loss_mask, clip_eps)
    jax.block_until_ready(loss4)
    ref_loss4, ref_cf4 = _value_loss_ref(v_bf, ov_bf, r_bf, loss_mask, clip_eps)
    assert jnp.allclose(loss4, ref_loss4, rtol=1e-5, atol=1e-6)
    assert jnp.allclose(clipfrac4, ref_cf4, rtol=1e-5, atol=1e-6)

    # ---- tiled path: explicit blocks, cross-tile accumulation ------------
    B2, T2 = 16, 256
    kk1, kk2, kk3 = jax.random.split(jax.random.PRNGKey(1), 3)
    v2 = jax.random.normal(kk1, (B2, T2), jnp.float32)
    ov2 = v2 + 0.3 * jax.random.normal(kk2, (B2, T2), jnp.float32)
    r2 = jax.random.normal(kk3, (B2, T2), jnp.float32)
    lens2 = jnp.array([256, 200, 128, 64, 250, 32, 100, 7,
                       256, 1, 77, 150, 90, 10, 222, 133])
    m2 = (jnp.arange(T2)[None, :] < lens2[:, None]).astype(jnp.float32)
    loss5, clipfrac5 = value_loss(v2, ov2, r2, m2, clip_eps,
                                  block_b=8, block_t=128)
    jax.block_until_ready(loss5)
    ref_loss5, ref_cf5 = _value_loss_ref(v2, ov2, r2, m2, clip_eps)
    assert jnp.allclose(loss5, ref_loss5, rtol=1e-5, atol=1e-5)
    assert jnp.allclose(clipfrac5, ref_cf5, rtol=1e-5, atol=1e-5)

    # ---- same data, lengths path + auto (budget-driven) tile selection ---
    loss6, clipfrac6 = value_loss(v2, ov2, r2, None, clip_eps,
                                  loss_mask_lengths=lens2)
    jax.block_until_ready(loss6)
    assert jnp.allclose(loss6, ref_loss5, rtol=1e-5, atol=1e-5)
    assert jnp.allclose(clipfrac6, ref_cf5, rtol=1e-5, atol=1e-5)

    # ---- moderate shape, fully automatic tiles ---------------------------
    B3, T3 = 32, 1024
    kq1, kq2, kq3 = jax.random.split(jax.random.PRNGKey(2), 3)
    v3 = jax.random.normal(kq1, (B3, T3), jnp.float32)
    ov3 = v3 + 0.3 * jax.random.normal(kq2, (B3, T3), jnp.float32)
    r3 = jax.random.normal(kq3, (B3, T3), jnp.float32)
    lens3 = (jax.random.randint(jax.random.PRNGKey(3), (B3,), 1, T3 + 1))
    m3 = (jnp.arange(T3)[None, :] < lens3[:, None]).astype(jnp.float32)
    loss7, clipfrac7 = value_loss(v3, ov3, r3, m3, clip_eps)
    jax.block_until_ready(loss7)
    ref_loss7, ref_cf7 = _value_loss_ref(v3, ov3, r3, m3, clip_eps)
    assert jnp.allclose(loss7, ref_loss7, rtol=1e-5, atol=1e-5)
    assert jnp.allclose(clipfrac7, ref_cf7, rtol=1e-5, atol=1e-5)

    # ---- jittable wrapper (device scalars, no host sync) -----------------
    value_loss_jit = jax.jit(value_loss, static_argnames=("clip_eps",))
    loss_j, cf_j = value_loss_jit(values, old_values, returns, loss_mask,
                                  clip_eps=clip_eps)
    jax.block_until_ready(loss_j)
    assert jnp.allclose(loss_j, ref_loss, rtol=1e-5, atol=1e-6)
    assert jnp.allclose(cf_j, ref_cf, rtol=1e-5, atol=1e-6)

    print("KERNEL_OK")
</pallas_src>

<mosaic_0001>
module attributes {stable_mosaic.version = 11 : i64} {
  func.func @kernel(%arg0: i32, %arg1: i32, %arg2: memref<4x16xf32, #tpu.memory_space<vmem>>, %arg3: memref<4x16xf32, #tpu.memory_space<vmem>>, %arg4: memref<4x16xf32, #tpu.memory_space<vmem>>, %arg5: memref<4x16xf32, #tpu.memory_space<vmem>>, %arg6: memref<1x1x4xf32, #tpu.memory_space<vmem>>, %arg7: memref<4x16xf32, #tpu.memory_space<vmem>>, %arg8: memref<4x16xf32, #tpu.memory_space<vmem>>, %arg9: memref<4x16xf32, #tpu.memory_space<vmem>>) attributes {dimension_semantics = [#tpu.dimension_semantics<parallel>, #tpu.dimension_semantics<arbitrary>], iteration_bounds = array<i64: 1, 1>, scalar_prefetch = 0 : i64, scratch_operands = 3 : i64, tpu.core_type = #tpu.core_type<tc>, window_params = [{transform_indices = @transform_0, window_bounds = array<i64: 4, 16>}, {transform_indices = @transform_1, window_bounds = array<i64: 4, 16>}, {transform_indices = @transform_2, window_bounds = array<i64: 4, 16>}, {transform_indices = @transform_3, window_bounds = array<i64: 4, 16>}, {transform_indices = @transform_4, window_bounds = array<i64: 1, 1, 4>}]} {
    %c0_i32 = arith.constant 0 : i32
    %0 = arith.cmpi eq, %arg1, %c0_i32 : i32
    %1 = arith.extui %0 : i1 to i32
    %c0_i32_0 = arith.constant 0 : i32
    %2 = arith.cmpi ne, %1, %c0_i32_0 : i32
    scf.if %2 {
      %cst_23 = arith.constant 0.000000e+00 : f32
      %35 = vector.broadcast %cst_23 : f32 to vector<4x16xf32>
      %c0_24 = arith.constant 0 : index
      %c0_25 = arith.constant 0 : index
      %36 = vector.load %arg7[%c0_24, %c0_25] : memref<4x16xf32, #tpu.memory_space<vmem>>, vector<4x16xf32>
      tpu.vector_store %arg7[%c0_24, %c0_25], %35 {strides = array<i32>} : memref<4x16xf32, #tpu.memory_space<vmem>>, vector<4x16xf32>,
      %cst_26 = arith.constant 0.000000e+00 : f32
      %37 = vector.broadcast %cst_26 : f32 to vector<4x16xf32>
      %c0_27 = arith.constant 0 : index
      %c0_28 = arith.constant 0 : index
      %38 = vector.load %arg8[%c0_27, %c0_28] : memref<4x16xf32, #tpu.memory_space<vmem>>, vector<4x16xf32>
      tpu.vector_store %arg8[%c0_27, %c0_28], %37 {strides = array<i32>} : memref<4x16xf32, #tpu.memory_space<vmem>>, vector<4x16xf32>,
      %cst_29 = arith.constant 0.000000e+00 : f32
      %39 = vector.broadcast %cst_29 : f32 to vector<4x16xf32>
      %c0_30 = arith.constant 0 : index
      %c0_31 = arith.constant 0 : index
      %40 = vector.load %arg9[%c0_30, %c0_31] : memref<4x16xf32, #tpu.memory_space<vmem>>, vector<4x16xf32>
      tpu.vector_store %arg9[%c0_30, %c0_31], %39 {strides = array<i32>} : memref<4x16xf32, #tpu.memory_space<vmem>>, vector<4x16xf32>,
    } else {
    }
    %c0 = arith.constant 0 : index
    %c0_1 = arith.constant 0 : index
    %3 = vector.load %arg2[%c0, %c0_1] : memref<4x16xf32, #tpu.memory_space<vmem>>, vector<4x16xf32>
    %c0_2 = arith.constant 0 : index
    %c0_3 = arith.constant 0 : index
    %4 = vector.load %arg4[%c0_2, %c0_3] : memref<4x16xf32, #tpu.memory_space<vmem>>, vector<4x16xf32>
    %c0_4 = arith.constant 0 : index
    %c0_5 = arith.constant 0 : index
    %5 = vector.load %arg3[%c0_4, %c0_5] : memref<4x16xf32, #tpu.memory_space<vmem>>, vector<4x16xf32>
    %6 = arith.subf %3, %5 : vector<4x16xf32>
    %cst = arith.constant -2.000000e-01 : f32
    %cst_6 = arith.constant 2.000000e-01 : f32
    %7 = vector.broadcast %cst : f32 to vector<4x16xf32>
    %8 = arith.maximumf %7, %6 : vector<4x16xf32>
    %9 = vector.broadcast %cst_6 : f32 to vector<4x16xf32>
    %10 = arith.minimumf %9, %8 : vector<4x16xf32>
    %11 = arith.addf %5, %10 : vector<4x16xf32>
    %12 = arith.subf %11, %4 : vector<4x16xf32>
    %13 = arith.mulf %12, %12 : vector<4x16xf32>
    %14 = arith.subf %3, %4 : vector<4x16xf32>
    %15 = arith.mulf %14, %14 : vector<4x16xf32>
    %16 = arith.maximumf %13, %15 : vector<4x16xf32>
    %17 = arith.cmpf ogt, %13, %15 : vector<4x16xf32>
    %18 = arith.extui %17 : vector<4x16xi1> to vector<4x16xi32>
    %19 = arith.sitofp %18 : vector<4x16xi32> to vector<4x16xf32>
    %c0_7 = arith.constant 0 : index
    %c0_8 = arith.constant 0 : index
    %20 = vector.load %arg5[%c0_7, %c0_8] : memref<4x16xf32, #tpu.memory_space<vmem>>, vector<4x16xf32>
    %c0_9 = arith.constant 0 : index
    %c0_10 = arith.constant 0 : index
    %21 = vector.load %arg7[%c0_9, %c0_10] : memref<4x16xf32, #tpu.memory_space<vmem>>, vector<4x16xf32>
    %22 = arith.mulf %16, %20 : vector<4x16xf32>
    %23 = arith.addf %21, %22 : vector<4x16xf32>
    %c0_11 = arith.constant 0 : index
    %c0_12 = arith.constant 0 : index
    %24 = vector.load %arg7[%c0_11, %c0_12] : memref<4x16xf32, #tpu.memory_space<vmem>>, vector<4x16xf32>
    tpu.vector_store %arg7[%c0_11, %c0_12], %23 {strides = array<i32>} : memref<4x16xf32, #tpu.memory_space<vmem>>, vector<4x16xf32>,
    %c0_13 = arith.constant 0 : index
    %c0_14 = arith.constant 0 : index
    %25 = vector.load %arg8[%c0_13, %c0_14] : memref<4x16xf32, #tpu.memory_space<vmem>>, vector<4x16xf32>
    %26 = arith.addf %25, %20 : vector<4x16xf32>
    %c0_15 = arith.constant 0 : index
    %c0_16 = arith.constant 0 : index
    %27 = vector.load %arg8[%c0_15, %c0_16] : memref<4x16xf32, #tpu.memory_space<vmem>>, vector<4x16xf32>
    tpu.vector_store %arg8[%c0_15, %c0_16], %26 {strides = array<i32>} : memref<4x16xf32, #tpu.memory_space<vmem>>, vector<4x16xf32>,
    %c0_17 = arith.constant 0 : index
    %c0_18 = arith.constant 0 : index
    %28 = vector.load %arg9[%c0_17, %c0_18] : memref<4x16xf32, #tpu.memory_space<vmem>>, vector<4x16xf32>
    %29 = arith.mulf %19, %20 : vector<4x16xf32>
    %30 = arith.addf %28, %29 : vector<4x16xf32>
    %c0_19 = arith.constant 0 : index
    %c0_20 = arith.constant 0 : index
    %31 = vector.load %arg9[%c0_19, %c0_20] : memref<4x16xf32, #tpu.memory_space<vmem>>, vector<4x16xf32>
    tpu.vector_store %arg9[%c0_19, %c0_20], %30 {strides = array<i32>} : memref<4x16xf32, #tpu.memory_space<vmem>>, vector<4x16xf32>,
    %c0_i32_21 = arith.constant 0 : i32
    %32 = arith.cmpi eq, %arg1, %c0_i32_21 : i32
    %33 = arith.extui %32 : i1 to i32
    %c0_i32_22 = arith.constant 0 : i32
    %34 = arith.cmpi ne, %33, %c0_i32_22 : i32
    scf.if %34 {
      %c0_23 = arith.constant 0 : index
      %c0_24 = arith.constant 0 : index
      %35 = vector.load %arg7[%c0_23, %c0_24] : memref<4x16xf32, #tpu.memory_space<vmem>>, vector<4x16xf32>
      %cst_25 = arith.constant dense<0.000000e+00> : vector<4xf32>
      %36 = vector.multi_reduction <add>, %35, %cst_25 [1] : vector<4x16xf32> to vector<4xf32>
      %37 = vector.shape_cast %36 : vector<4xf32> to vector<4x1xf32>
      %c0_26 = arith.constant 0 : index
      %c0_27 = arith.constant 0 : index
      %38 = vector.load %arg8[%c0_26, %c0_27] : memref<4x16xf32, #tpu.memory_space<vmem>>, vector<4x16xf32>
      %cst_28 = arith.constant dense<0.000000e+00> : vector<4xf32>
      %39 = vector.multi_reduction <add>, %38, %cst_28 [1] : vector<4x16xf32> to vector<4xf32>
      %40 = vector.shape_cast %39 : vector<4xf32> to vector<4x1xf32>
      %41 = arith.divf %37, %40 : vector<4x1xf32>
      %42 = vector.shape_cast %41 : vector<4x1xf32> to vector<1x4x1xf32>
      %cst_29 = arith.constant dense<0.000000e+00> : vector<1xf32>
      %43 = vector.multi_reduction <add>, %42, %cst_29 [1, 2] : vector<1x4x1xf32> to vector<1xf32>
      %44 = vector.shape_cast %43 : vector<1xf32> to vector<1x1x1xf32>
      %45 = vector.extract %44[0, 0, 0] : f32 from vector<1x1x1xf32>
      %c0_30 = arith.constant 0 : index
      %c0_31 = arith.constant 0 : index
      %46 = vector.load %arg9[%c0_30, %c0_31] : memref<4x16xf32, #tpu.memory_space<vmem>>, vector<4x16xf32>
      %47 = vector.shape_cast %46 : vector<4x16xf32> to vector<1x4x16xf32>
      %cst_32 = arith.constant dense<0.000000e+00> : vector<1xf32>
      %48 = vector.multi_reduction <add>, %47, %cst_32 [1, 2] : vector<1x4x16xf32> to vector<1xf32>
      %49 = vector.shape_cast %48 : vector<1xf32> to vector<1x1x1xf32>
      %50 = vector.extract %49[0, 0, 0] : f32 from vector<1x1x1xf32>
      %51 = vector.shape_cast %40 : vector<4x1xf32> to vector<1x4x1xf32>
      %cst_33 = arith.constant dense<0.000000e+00> : vector<1xf32>
      %52 = vector.multi_reduction <add>, %51, %cst_33 [1, 2] : vector<1x4x1xf32> to vector<1xf32>
      %53 = vector.shape_cast %52 : vector<1xf32> to vector<1x1x1xf32>
      %54 = vector.extract %53[0, 0, 0] : f32 from vector<1x1x1xf32>
      %55 = tpu.iota {dimensions = array<i32: 2>} : vector<1x1x4xi32>
      %c0_i32_34 = arith.constant 0 : i32
      %56 = vector.broadcast %c0_i32_34 : i32 to vector<1x1x4xi32>
      %57 = arith.cmpi eq, %55, %56 : vector<1x1x4xi32>
      %c1_i32 = arith.constant 1 : i32
      %58 = vector.broadcast %c1_i32 : i32 to vector<1x1x4xi32>
      %59 = arith.cmpi eq, %55, %58 : vector<1x1x4xi32>
      %c2_i32 = arith.constant 2 : i32
      %60 = vector.broadcast %c2_i32 : i32 to vector<1x1x4xi32>
      %61 = arith.cmpi eq, %55, %60 : vector<1x1x4xi32>
      %cst_35 = arith.constant 0.000000e+00 : f32
      %62 = vector.broadcast %54 : f32 to vector<1x1x4xf32>
      %63 = vector.broadcast %cst_35 : f32 to vector<1x1x4xf32>
      %64 = arith.select %61, %62, %63 : vector<1x1x4xi1>, vector<1x1x4xf32>
      %65 = vector.broadcast %50 : f32 to vector<1x1x4xf32>
      %66 = arith.select %59, %65, %64 : vector<1x1x4xi1>, vector<1x1x4xf32>
      %67 = vector.broadcast %45 : f32 to vector<1x1x4xf32>
      %68 = arith.select %57, %67, %66 : vector<1x1x4xi1>, vector<1x1x4xf32>
      %c0_36 = arith.constant 0 : index
      %c0_37 = arith.constant 0 : index
      %c0_38 = arith.constant 0 : index
      %69 = vector.load %arg6[%c0_36, %c0_37, %c0_38] : memref<1x1x4xf32, #tpu.memory_space<vmem>>, vector<1x1x4xf32>
      tpu.vector_store %arg6[%c0_36, %c0_37, %c0_38], %68 {strides = array<i32>} : memref<1x1x4xf32, #tpu.memory_space<vmem>>, vector<1x1x4xf32>,
    } else {
    }
    return
  }
  func.func @transform_0(%arg0: i32, %arg1: i32) -> (i32, i32) {
    %c0_i32 = arith.constant 0 : i32
    return %arg0, %arg1 : i32, i32
  }
  func.func @transform_1(%arg0: i32, %arg1: i32) -> (i32, i32) {
    %c0_i32 = arith.constant 0 : i32
    return %arg0, %arg1 : i32, i32
  }
  func.func @transform_2(%arg0: i32, %arg1: i32) -> (i32, i32) {
    %c0_i32 = arith.constant 0 : i32
    return %arg0, %arg1 : i32, i32
  }
  func.func @transform_3(%arg0: i32, %arg1: i32) -> (i32, i32) {
    %c0_i32 = arith.constant 0 : i32
    return %arg0, %arg1 : i32, i32
  }
  func.func @transform_4(%arg0: i32, %arg1: i32) -> (i32, i32, i32) {
    %c0_i32 = arith.constant 0 : i32
    %c0_i32_0 = arith.constant 0 : i32
    %c0_i32_1 = arith.constant 0 : i32
    return %arg0, %c0_i32, %c0_i32_0 : i32, i32, i32
  }
}

</mosaic_0001>

<bundles_post_ra>
// kernel: tpu_custom_call.1
= control target key start
LH: loop header
LB: loop body
LE: loop exit
PB: predicated region body
PF: predicated region fallthrough
CT: control target
= control target key end

     0   :  { %9 = vsyncpa [#allocation6], 0  ;;  %s318_s0 = inlined_call_operand.hbm [shape: f32[4,16], index: 0, kind: input, shape index: {}]   ;;  %s319_s1 = inlined_call_operand.hbm [shape: f32[4,16], index: 1, kind: input, shape index: {}]   ;;  %s320_s2 = inlined_call_operand.vmem [shape: f32[4,16], index: 2, kind: input, shape index: {}]   ;;  %s321_s3 = inlined_call_operand.vmem [shape: f32[4,16], index: 3, kind: input, shape index: {}]   ;;  %s322_s4 = inlined_call_operand.hbm [shape: f32[1,1,4], index: 4, kind: output, shape index: {}]  }
   0x1   :  { %10 = vsyncpa [#allocation9], 0 }
   0x2   :  { %11 = vsyncpa [#allocation7], 0  ;;  %s238_s15 = smov [#allocation5]   ;;  %s239_s17 = smov [#allocation8]  }
   0x3   :  { %s18_s16 = sshll.u32 %s238_s15, 4  ;;  %s28_s18 = sshll.u32 %s239_s17, 4  ;;  %s19_s16 = int_to_ptr.vmem [resolvable:$true] %s18_s16  ;;  %s29_s18 = int_to_ptr.vmem [resolvable:$true] %s28_s18 }
   0x4   :  { %s166_s21 = scalar_lea.hbm %s318_s0, 64 }
   0x5   :  { %p167_p0 = scmp.ne.s32.totalorder %s318_s0, %s166_s21  ;;  %p170_p1 = scmp.lt.u32.totalorder %s166_s21, %s318_s0 }
   0x7   :  { %p172_p2 = pnand %p170_p1, %p167_p0 }
   0x9   :  { %175 = shalt.err (!%p172_p2)
}
   0xa   :  { %s176_s26 = scalar_lea.vmem %s19_s16, 64  ;;  %p181_p4 = scmp.lt.s32.totalorder %s19_s16, %s19_s16 }
   0xb   :  { %p177_p3 = scmp.ne.s32.totalorder %s19_s16, %s176_s26  ;;  %p182_p5 = scmp.lt.s32.totalorder %s176_s26, %s176_s26 }
   0xd   :  { %p183_p6 = por %p182_p5, %p181_p4 }
   0xf   :  { %p184_p7 = pnand %p183_p6, %p177_p3 }
  0x11   :  { %187 = shalt.err (!%p184_p7)
}
  0x12   :  { %21 = dma.hbm_to_vmem [thread:$0]  %s318_s0, 64, %s19_s16, [#allocation6]  }
  0x13   :  { %s188_s5 = scalar_lea.hbm %s319_s1, 64 }
  0x14   :  { %p189_p8 = scmp.ne.s32.totalorder %s319_s1, %s188_s5  ;;  %p192_p9 = scmp.lt.u32.totalorder %s188_s5, %s319_s1 }
  0x16   :  { %p194_p10 = pnand %p192_p9, %p189_p8 }
  0x18   :  { %197 = shalt.err (!%p194_p10)
}
  0x19   :  { %s198_s10 = scalar_lea.vmem %s29_s18, 64  ;;  %p203_p12 = scmp.lt.s32.totalorder %s29_s18, %s29_s18 }
  0x1a   :  { %p199_p11 = scmp.ne.s32.totalorder %s29_s18, %s198_s10  ;;  %p204_p13 = scmp.lt.s32.totalorder %s198_s10, %s198_s10 }
  0x1c   :  { %p205_p0 = por %p204_p13, %p203_p12 }
  0x1e   :  { %p206_p1 = pnand %p205_p0, %p199_p11 }
  0x20   :  { %209 = shalt.err (!%p206_p1)
}
  0x21   :  { %31 = dma.hbm_to_vmem [thread:$0]  %s319_s1, 64, %s29_s18, [#allocation9]  }
  0x22   :  { %232 = dma.done.wait [#allocation6], 64  }
  0x23   :  { %233 = vsyncadd [#allocation6], 4294967232 }
  0x24   :  { %234 = dma.done.wait [#allocation9], 64  }
  0x25   :  { %235 = vsyncadd [#allocation9], 4294967232  ;;  %vm46_vm0 = vcmask 125952   ;;  %v240_v0 = vmov 0.0   ;;  %v65_v1 = vld [vmem:[%s321_s3] sm:$0xf]  ;;  %v123_v55 = vlaneseq }
  0x26   :  { %48 = vst.msk [vmem:[#allocation3] sm:$0xf] %vm46_vm0, %v240_v0  ;;  %47 = vst.msk [vmem:[#allocation2] sm:$0xf] %vm46_vm0, %v240_v0  ;;  %v50_v2 = vld [vmem:[#allocation5] sm:$0xf] }
  0x27   :  { %49 = vst.msk [vmem:[#allocation4] sm:$0xf] %vm46_vm0, %v240_v0  ;;  %v51_v4 = vld [vmem:[%s320_s2] sm:$0xf]  ;;  %v52_v5 = vld [vmem:[#allocation8] sm:$0xf] }
  0x28   :  { %v53_v7 = vsub.f32 %v50_v2, %v52_v5  ;;  %v59_v9 = vsub.f32 %v50_v2, %v51_v4  ;;  %vm91_vm2 = vcmask 3072   ;;  %v124_v56 = vand.u32 127, %v123_v55  ;;  %s241_s16 = smov [#allocation10]  }
  0x29   :  { %s142_s17 = sshll.u32 %s241_s16, 4  ;;  %vm134_vm6 = vcmask 24576   ;;  %s143_s17 = int_to_ptr.vmem [resolvable:$true] %s142_s17 }
  0x2a   :  { %v152_v8 = vclamps-f32 %v53_v7, 0.2  ;;  %v60_v12 = vmul.f32 %v59_v9, %v59_v9  ;;  %vm127_vm3 = vcmp.eq.s32.totalorder %v124_v56, 2  ;;  %vm126_vm4 = vcmp.eq.s32.totalorder %v124_v56, 1  ;;  %s210_s18 = scalar_lea.vmem %s143_s17, 16  ;;  %s214_s19 = scalar_lea.vmem %s143_s17, 32 }
  0x2b   :  { %vm125_vm5 = vcmp.eq.s32.totalorder %v124_v56, 0  ;;  %p211_p2 = scmp.ne.s32.totalorder %s143_s17, %s210_s18  ;;  %p215_p3 = scmp.lt.s32.totalorder %s143_s17, %s143_s17 }
  0x2c   :  { %v56_v10 = vadd.f32 %v152_v8, %v52_v5  ;;  %p216_p4 = scmp.lt.s32.totalorder %s214_s19, %s210_s18 }
  0x2d   :  { %v71_v3 = vld [vmem:[#allocation3] sm:$0xf]  ;;  %v66_v17 = vld [vmem:[#allocation2] sm:$0xf] }
  0x2e   :  { %v72_v6 = vadd.f32 %v71_v3, %v65_v1  ;;  %v57_v11 = vsub.f32 %v56_v10, %v51_v4  ;;  %v74_v24 = vld [vmem:[#allocation4] sm:$0xf]  ;;  %p217_p5 = por %p216_p4, %p215_p3 }
  0x30   :  { %73 = vst.msk [vmem:[#allocation3] sm:$0xf] %vm46_vm0, %v72_v6  ;;  %v58_v13 = vmul.f32 %v57_v11, %v57_v11  ;;  %p218_p6 = pnand %p217_p5, %p211_p2 }
  0x32   :  { %v61_v16 = vmax.f32 %v58_v13, %v60_v12  ;;  %vm62_vm1 = vcmp.gt.f32.partialorder %v58_v13, %v60_v12 }
  0x33   :  { %v153_v22 = vsel %vm62_vm1, 1.0, %v240_v0 }
  0x34   :  { %v67_v18 = vmul.f32 %v65_v1, %v61_v16  ;;  %v75_v23 = vmul.f32 %v153_v22, %v65_v1 }
  0x36   :  { %v68_v19 = vadd.f32 %v67_v18, %v66_v17  ;;  %v76_v25 = vadd.f32 %v75_v23, %v74_v24 }
  0x37   :  { %v85_v14 = vld [vmem:[#allocation3] sm:$0xf] }
  0x38   :  { %v86_v15 = vsel %vm46_vm0, %v85_v14, 0.0  ;;  %70 = vst.msk [vmem:[#allocation2] sm:$0xf] %vm46_vm0, %v68_v19  ;;  %77 = vst.msk [vmem:[#allocation4] sm:$0xf] %vm46_vm0, %v76_v25 }
  0x39   :  { %87 = vadd.xlane.f32.xlu0 %v86_v15 }
  0x3f   :  { %v81_v20 = vld [vmem:[#allocation2] sm:$0xf]  ;;  %v102_v31 = vld [vmem:[#allocation4] sm:$0xf] }
  0x40   :  { %v82_v21 = vsel %vm46_vm0, %v81_v20, 0.0  ;;  %v103_v33 = vsel %vm46_vm0, %v102_v31, 0.0 }
  0x41   :  { %83 = vadd.xlane.f32.xlu0 %v82_v21 }
  0xc6   :  { %v88_v26 = vpop.xlane.xlu0 %87 }
  0xc7   :  { %v113_v27 = vsel %vm91_vm2, %v88_v26, 0.0  ;;  %164 = vrcp.f32 %v88_v26 }
  0xc8   :  { %114 = vadd.xlane.f32.xlu0 %v113_v27 }
  0xce   :  { %v84_v29 = vpop.xlane.xlu0 %83 }
  0xd1   :  { %v165_v28 = vpop.eup %164 }
  0xd2   :  { %v90_v30 = vmul.f32 %v165_v28, %v84_v29 }
  0xd4   :  { %v92_v32 = vsel %vm91_vm2, %v90_v30, 0.0 }
  0xd5   :  { %93 = vadd.xlane.f32.xlu1 %v92_v32 }
  0xd9   :  { %104 = vadd.xlane.f32.xlu1 %v103_v33 }
 0x155   :  { %v115_v34 = vpop.xlane.xlu0 %114 }
 0x156   :  { %v116_v35 = vrot.slane %v115_v34, 4 }
 0x158   :  { %v117_v36 = vadd.f32 %v116_v35, %v115_v34 }
 0x15a   :  { %v118_v40 = vrot.slane %v117_v36, 2 }
 0x15c   :  { %v119_v46 = vadd.f32 %v118_v40, %v117_v36 }
 0x15e   :  { %v120_v51 = vrot.slane %v119_v46, 1 }
 0x160   :  { %v121_v54 = vadd.f32 %v120_v51, %v119_v46 }
 0x162   :  { %v94_v37 = vpop.xlane.xlu1 %93 }
 0x163   :  { %v95_v38 = vrot.slane %v94_v37, 4 }
 0x165   :  { %v96_v39 = vadd.f32 %v95_v38, %v94_v37 }
 0x166   :  { %v105_v41 = vpop.xlane.xlu1 %104 }
 0x167   :  { %v97_v42 = vrot.slane %v96_v39, 2  ;;  %v106_v43 = vrot.slane %v105_v41, 4 }
 0x169   :  { %v107_v44 = vadd.f32 %v106_v43, %v105_v41  ;;  %v98_v45 = vadd.f32 %v97_v42, %v96_v39 }
 0x16b   :  { %v108_v47 = vrot.slane %v107_v44, 2  ;;  %v99_v48 = vrot.slane %v98_v45, 1 }
 0x16d   :  { %v109_v49 = vadd.f32 %v108_v47, %v107_v44  ;;  %v100_v50 = vadd.f32 %v99_v48, %v98_v45 }
 0x16f   :  { %154 = vpush %v100_v50  ;;  %v110_v52 = vrot.slane %v109_v49, 1 }
 0x171   :  { %v111_v53 = vadd.f32 %v110_v52, %v109_v49 }
 0x173   :  { %156 = vpush %v111_v53 }
 0x174   :  { %158 = vpush %v121_v54 }
 0x1a0   :  { %s155_s2 = spop %154 }
 0x1a1   :  { %v132_v60 = vstv %s155_s2 }
 0x1a4   :  { %s157_s3 = spop %156 }
 0x1a5   :  { %v130_v57 = vstv %s157_s3  ;;  %s159_s15 = spop %158 }
 0x1a6   :  { %v128_v58 = vstv %s159_s15 }
 0x1a7   :  { %v129_v59 = vsel %vm127_vm3, %v128_v58, 0.0 }
 0x1a8   :  { %v131_v61 = vsel %vm126_vm4, %v130_v57, %v129_v59 }
 0x1a9   :  { %v133_v62 = vsel %vm125_vm5, %v132_v60, %v131_v61 }
 0x1aa   :  { %135 = vst.msk [vmem:[#allocation10] sm:$0x1] %vm134_vm6, %v133_v62 }
 0x1ab   :  { %221 = shalt.err (!%p218_p6)
}
 0x1ac   :  { %s222_s22 = scalar_lea.hbm %s322_s4, 16 }
 0x1ad   :  { %p223_p7 = scmp.ne.s32.totalorder %s322_s4, %s222_s22  ;;  %p226_p8 = scmp.lt.u32.totalorder %s222_s22, %s322_s4 }
 0x1af   :  { %p228_p9 = pnand %p226_p8, %p223_p7 }
 0x1b1   :  { %231 = shalt.err (!%p228_p9)
}
 0x1b2   :  { %145 = dma.vmem_to_hbm [thread:$0]  %s143_s17, 16, %s322_s4, [#allocation7]  }
 0x1b3   :  { %236 = dma.done.wait [#allocation7], 16  }
 0x1b4   :  { %237 = vsyncadd [#allocation7], 4294967280 }
 0x1b5   :  { %149 = vsyncpa [#allocation6], 1 }
 0x1b6   :  { %150 = vsyncpa [#allocation9], 1 }
 0x1b7   :  { %151 = vsyncpa [#allocation7], 1 }

</bundles_post_ra>
